<compile_context>
chip_gen: v5e
topology: v5e:2x2
jax: 0.10.0
libtpu: 0.0.40
codegen_flags: <defaults>
</compile_context>

<pallas_src>
import jax
import jax.numpy as jnp
from jax.experimental import pallas as pl
from jax.experimental.pallas import tpu as pltpu

EPS = 1e-5


def _round_up(v, m):
    return -(-v // m) * m


def _make_convnet_kernel(*, N, L, C1, C2, K1, K2, W, KC1, KC2, offs, mm_dtype):
    """Builds the fused forward kernel for static shapes.

    x_ref: (C0p, W) zero-padded input, column index = n*L + l.
    p_ref: packed parameter buffer (weights + BN affine), see wrapper.
    o_ref: (C2, W) lane-dense output slab (invalid lanes hold garbage).
    """
    L1 = L - (K1 - 1)
    L2 = L1 - (K2 - 1)

    def shift_left(a, k):
        # Column j <- a[:, j+k]; the k zero-filled tail columns only ever land
        # on lanes that are masked out of the BN stats / stripped by wrapper.
        if k == 0:
            return a
        return jnp.concatenate(
            [a[:, k:], jnp.zeros((a.shape[0], k), a.dtype)], axis=1)

    def im2col(a, k_size):
        # (C, W) -> (k_size*C, W), non-compacted: block k, column n*L+l holds
        # a[:, n*L+l+k].  One whole-width lane shift per tap; sublane concat of
        # 8-aligned blocks is pure vreg placement.
        return jnp.concatenate([shift_left(a, k) for k in range(k_size)], axis=0)

    def mm(w, xcol):
        if mm_dtype != jnp.float32:
            w = w.astype(mm_dtype)
            xcol = xcol.astype(mm_dtype)
        return jnp.dot(w, xcol, preferred_element_type=jnp.float32)

    def bn_relu(h, gamma, beta, mask, inv_n):
        # Train-mode BatchNorm1d over the valid lanes only, folded to one
        # scale/shift FMA, then ReLU.  Variance via E[h^2] - mean^2 (one pass).
        hm = jnp.where(mask, h, 0.0)
        s = jnp.sum(hm, axis=1, keepdims=True)            # (C, 1)
        s2 = jnp.sum(hm * hm, axis=1, keepdims=True)      # (C, 1)
        mean = s * inv_n
        var = s2 * inv_n - mean * mean                    # biased, as in PyTorch train BN
        scale = gamma * jax.lax.rsqrt(var + EPS)          # (C, 1)
        shift = beta - mean * scale                       # (C, 1)
        return jnp.maximum(h * scale + shift, 0.0)

    def kernel(x_ref, p_ref, o_ref):
        # Per-lane validity masks for the non-compacted (col = n*L + l) layout.
        lane = jax.lax.broadcasted_iota(jnp.int32, (1, W), 1)

        def valid_mask(l_out):
            m = (lane >= 0) & (lane < l_out)
            for n in range(1, N):
                m = m | ((lane >= n * L) & (lane < n * L + l_out))
            return m

        mask1 = valid_mask(L1)
        mask2 = valid_mask(L2)

        # Packed parameter buffer slices (all sublane-aligned, lane offset 0).
        w1 = p_ref[0:C1, 0:KC1]                                     # (C1, K1*C0p)
        w2 = p_ref[offs["w2"]:offs["w2"] + C2, 0:KC2]               # (C2, K2*C1)
        g1 = p_ref[offs["g1"]:offs["g1"] + C1, 0:1]                 # (C1, 1)
        be1 = p_ref[offs["b1"]:offs["b1"] + C1, 0:1]                # (C1, 1)
        g2 = p_ref[offs["g2"]:offs["g2"] + C2, 0:1]                 # (C2, 1)
        be2 = p_ref[offs["b2"]:offs["b2"] + C2, 0:1]                # (C2, 1)

        x = x_ref[...]                                              # (C0p, W)

        # ---- layer 1: im2col + single MXU matmul + fused BN/ReLU ----
        h1 = mm(w1, im2col(x, K1))                                  # (C1, W)
        a1 = bn_relu(h1, g1, be1, mask1, 1.0 / (N * L1))

        # ---- layer 2 ----
        h2 = mm(w2, im2col(a1, K2))                                 # (C2, W)

        # Lane-dense unmasked store of the full (C2, W) slab; wrapper strips
        # the invalid lanes.  No in-kernel concat/zero-padding needed.
        o_ref[...] = bn_relu(h2, g2, be2, mask2, 1.0 / (N * L2))

    return kernel


def convnet_forward(x, params, *, use_bf16_matmul=False):
    """x: (N, C_in, L) float32.  Returns (N, C_out, L_out) float32."""
    N, C0, L = x.shape
    C1, _, K1 = params["w1"].shape
    C2, _, K2 = params["w2"].shape
    L1 = L - (K1 - 1)
    L2 = L1 - (K2 - 1)

    C0p = _round_up(C0, 8)          # 21 -> 24: tap blocks start on sublane tiles
    C1p = _round_up(C1, 8)
    C2p = _round_up(C2, 8)
    W = pl.cdiv(N * L, 128) * 128   # lane-dense working width (valid lanes: N*L)
    KC1 = K1 * C0p                  # 144
    KC2 = K2 * C1                   # 96
    PW = max(KC1, KC2)              # packed parameter buffer width

    # --- layout plumbing in XLA (free): (N,C,L) -> zero-padded (C0p, W) ------
    x2d = jnp.transpose(x, (1, 0, 2)).reshape(C0, N * L)
    x2d = jnp.pad(x2d, ((0, C0p - C0), (0, W - N * L)))

    # --- single packed parameter buffer: weights + BN affine -----------------
    w1p = jnp.pad(params["w1"], ((0, 0), (0, C0p - C0), (0, 0)))      # (C1,C0p,K1)
    w1_2d = jnp.transpose(w1p, (0, 2, 1)).reshape(C1, KC1)            # (16, 144)
    w2_2d = jnp.transpose(params["w2"], (0, 2, 1)).reshape(C2, KC2)   # (8, 96)

    def _pad_block(v2d, rows):
        return jnp.pad(v2d, ((0, rows - v2d.shape[0]), (0, PW - v2d.shape[1])))

    pbuf = jnp.concatenate([
        _pad_block(w1_2d, C1p),
        _pad_block(w2_2d, C2p),
        _pad_block(params["g1"].reshape(C1, 1), C1p),
        _pad_block(params["be1"].reshape(C1, 1), C1p),
        _pad_block(params["g2"].reshape(C2, 1), C2p),
        _pad_block(params["be2"].reshape(C2, 1), C2p),
    ], axis=0)                                                        # (72, 144)

    offs = dict(
        w2=C1p,
        g1=C1p + C2p,
        b1=C1p + C2p + C1p,
        g2=C1p + C2p + 2 * C1p,
        b2=C1p + C2p + 2 * C1p + C2p,
    )
    # NOTE: conv biases b1/b2 are intentionally NOT packed — a per-channel conv
    # bias is exactly cancelled by training-mode BatchNorm's mean subtraction.

    # Keep f32 operands by default (v5e VPU has no bf16; keeps 1e-4 tolerance).
    mm_dtype = jnp.bfloat16 if use_bf16_matmul else jnp.float32

    kernel = _make_convnet_kernel(N=N, L=L, C1=C1, C2=C2, K1=K1, K2=K2, W=W,
                                  KC1=KC1, KC2=KC2, offs=offs, mm_dtype=mm_dtype)

    flops = 2 * (C1 * KC1 + C2 * KC2) * W
    bytes_accessed = 4 * (x2d.size + pbuf.size + C2 * W)

    vmem_spec = pl.BlockSpec(memory_space=pltpu.MemorySpace.VMEM)
    out2d = pl.pallas_call(
        kernel,
        out_shape=jax.ShapeDtypeStruct((C2, W), jnp.float32),
        in_specs=[vmem_spec, vmem_spec],
        out_specs=vmem_spec,
        cost_estimate=pl.CostEstimate(flops=flops, transcendentals=C1 + C2,
                                      bytes_accessed=bytes_accessed),
    )(x2d, pbuf)

    # (C2, W) slab -> (N, C2, L2): strip invalid lanes outside the kernel.
    out = out2d[:, :N * L].reshape(C2, N, L)[:, :, :L2]
    return jnp.transpose(out, (1, 0, 2))


def reference_forward(x, params):
    """Pure-JAX reference with PyTorch-equivalent semantics (for self-check)."""
    def conv1d(x, w, b):
        K = w.shape[-1]
        L_out = x.shape[-1] - (K - 1)
        acc = jnp.zeros((x.shape[0], w.shape[0], L_out), jnp.float32)
        for k in range(K):
            acc = acc + jnp.einsum("oi,nil->nol", w[:, :, k], x[:, :, k:k + L_out])
        return acc + b.reshape(1, -1, 1)

    def bn_relu(h, g, be):
        m = jnp.mean(h, axis=(0, 2), keepdims=True)
        v = jnp.mean(jnp.square(h - m), axis=(0, 2), keepdims=True)
        y = (h - m) * jax.lax.rsqrt(v + EPS) * g.reshape(1, -1, 1) + be.reshape(1, -1, 1)
        return jnp.maximum(y, 0.0)

    a1 = bn_relu(conv1d(x, params["w1"], params["b1"]), params["g1"], params["be1"])
    a2 = bn_relu(conv1d(a1, params["w2"], params["b2"]), params["g2"], params["be2"])
    return a2


def init_params(key, channels=(21, 16, 8), kernel_sizes=(6, 6)):
    """Deterministic synthetic parameters (shapes mirror nn.Conv1d / BatchNorm1d)."""
    c0, c1, c2 = channels
    k1, k2 = kernel_sizes
    ks = jax.random.split(key, 8)
    w1 = jax.random.uniform(ks[0], (c1, c0, k1), jnp.float32, -0.1, 0.1)
    b1 = jax.random.uniform(ks[1], (c1,), jnp.float32, -0.1, 0.1)
    w2 = jax.random.uniform(ks[2], (c2, c1, k2), jnp.float32, -0.1, 0.1)
    b2 = jax.random.uniform(ks[3], (c2,), jnp.float32, -0.1, 0.1)
    g1 = 1.0 + 0.1 * jax.random.normal(ks[4], (c1,), jnp.float32)
    be1 = 0.1 * jax.random.normal(ks[5], (c1,), jnp.float32)
    g2 = 1.0 + 0.1 * jax.random.normal(ks[6], (c2,), jnp.float32)
    be2 = 0.1 * jax.random.normal(ks[7], (c2,), jnp.float32)
    return dict(w1=w1, b1=b1, g1=g1, be1=be1, w2=w2, b2=b2, g2=g2, be2=be2)


if __name__ == "__main__":
    key = jax.random.PRNGKey(0)
    k_x, k_p = jax.random.split(key)

    N, C_IN, L = 2, 21, 36              # -> output (2, 8, 26), per the module docstring
    x = jax.random.normal(k_x, (N, C_IN, L), dtype=jnp.float32)
    params = init_params(k_p)

    out = jax.block_until_ready(convnet_forward(x, params))
    ref = reference_forward(x, params)

    assert out.shape == (N, 8, 26), out.shape
    assert jnp.allclose(out, ref, atol=1e-4, rtol=1e-4), \
        f"mismatch vs JAX reference (max abs err {float(jnp.max(jnp.abs(out - ref)))})"

    print("KERNEL_OK")
</pallas_src>

<mosaic_0001>
module attributes {stable_mosaic.version = 11 : i64} {
  func.func @kernel(%arg0: memref<24x128xf32, #tpu.memory_space<vmem>>, %arg1: memref<72x144xf32, #tpu.memory_space<vmem>>, %arg2: memref<8x128xf32, #tpu.memory_space<vmem>>) attributes {dimension_semantics = [], scalar_prefetch = 0 : i64, scratch_operands = 0 : i64, tpu.core_type = #tpu.core_type<tc>} {
    %0 = tpu.iota {dimensions = array<i32: 1>} : vector<1x128xi32>
    %c0_i32 = arith.constant 0 : i32
    %1 = vector.broadcast %c0_i32 : i32 to vector<1x128xi32>
    %2 = arith.cmpi sge, %0, %1 : vector<1x128xi32>
    %c31_i32 = arith.constant 31 : i32
    %3 = vector.broadcast %c31_i32 : i32 to vector<1x128xi32>
    %4 = arith.cmpi slt, %0, %3 : vector<1x128xi32>
    %5 = arith.andi %2, %4 : vector<1x128xi1>
    %c36_i32 = arith.constant 36 : i32
    %6 = vector.broadcast %c36_i32 : i32 to vector<1x128xi32>
    %7 = arith.cmpi sge, %0, %6 : vector<1x128xi32>
    %c67_i32 = arith.constant 67 : i32
    %8 = vector.broadcast %c67_i32 : i32 to vector<1x128xi32>
    %9 = arith.cmpi slt, %0, %8 : vector<1x128xi32>
    %10 = arith.andi %7, %9 : vector<1x128xi1>
    %11 = arith.ori %5, %10 : vector<1x128xi1>
    %c0_i32_0 = arith.constant 0 : i32
    %12 = vector.broadcast %c0_i32_0 : i32 to vector<1x128xi32>
    %13 = arith.cmpi sge, %0, %12 : vector<1x128xi32>
    %c26_i32 = arith.constant 26 : i32
    %14 = vector.broadcast %c26_i32 : i32 to vector<1x128xi32>
    %15 = arith.cmpi slt, %0, %14 : vector<1x128xi32>
    %16 = arith.andi %13, %15 : vector<1x128xi1>
    %c36_i32_1 = arith.constant 36 : i32
    %17 = vector.broadcast %c36_i32_1 : i32 to vector<1x128xi32>
    %18 = arith.cmpi sge, %0, %17 : vector<1x128xi32>
    %c62_i32 = arith.constant 62 : i32
    %19 = vector.broadcast %c62_i32 : i32 to vector<1x128xi32>
    %20 = arith.cmpi slt, %0, %19 : vector<1x128xi32>
    %21 = arith.andi %18, %20 : vector<1x128xi1>
    %22 = arith.ori %16, %21 : vector<1x128xi1>
    %c0 = arith.constant 0 : index
    %c0_2 = arith.constant 0 : index
    %23 = vector.load %arg1[%c0, %c0_2] : memref<72x144xf32, #tpu.memory_space<vmem>>, vector<16x144xf32>
    %c16 = arith.constant 16 : index
    %c0_3 = arith.constant 0 : index
    %24 = vector.load %arg1[%c16, %c0_3] : memref<72x144xf32, #tpu.memory_space<vmem>>, vector<8x96xf32>
    %c24 = arith.constant 24 : index
    %c0_4 = arith.constant 0 : index
    %25 = vector.load %arg1[%c24, %c0_4] : memref<72x144xf32, #tpu.memory_space<vmem>>, vector<16x1xf32>
    %c40 = arith.constant 40 : index
    %c0_5 = arith.constant 0 : index
    %26 = vector.load %arg1[%c40, %c0_5] : memref<72x144xf32, #tpu.memory_space<vmem>>, vector<16x1xf32>
    %c56 = arith.constant 56 : index
    %c0_6 = arith.constant 0 : index
    %27 = vector.load %arg1[%c56, %c0_6] : memref<72x144xf32, #tpu.memory_space<vmem>>, vector<8x1xf32>
    %c64 = arith.constant 64 : index
    %c0_7 = arith.constant 0 : index
    %28 = vector.load %arg1[%c64, %c0_7] : memref<72x144xf32, #tpu.memory_space<vmem>>, vector<8x1xf32>
    %c0_8 = arith.constant 0 : index
    %c0_9 = arith.constant 0 : index
    %29 = vector.load %arg0[%c0_8, %c0_9] : memref<24x128xf32, #tpu.memory_space<vmem>>, vector<24x128xf32>
    %30 = vector.extract_strided_slice %29 {offsets = [0, 1], sizes = [24, 127], strides = [1, 1]} : vector<24x128xf32> to vector<24x127xf32>
    %cst = arith.constant 0.000000e+00 : f32
    %31 = vector.broadcast %cst : f32 to vector<24x1xf32>
    %32 = tpu.concatenate %30, %31 in 1 : vector<24x127xf32>, vector<24x1xf32> -> vector<24x128xf32>
    %33 = vector.extract_strided_slice %29 {offsets = [0, 2], sizes = [24, 126], strides = [1, 1]} : vector<24x128xf32> to vector<24x126xf32>
    %cst_10 = arith.constant 0.000000e+00 : f32
    %34 = vector.broadcast %cst_10 : f32 to vector<24x2xf32>
    %35 = tpu.concatenate %33, %34 in 1 : vector<24x126xf32>, vector<24x2xf32> -> vector<24x128xf32>
    %36 = vector.extract_strided_slice %29 {offsets = [0, 3], sizes = [24, 125], strides = [1, 1]} : vector<24x128xf32> to vector<24x125xf32>
    %cst_11 = arith.constant 0.000000e+00 : f32
    %37 = vector.broadcast %cst_11 : f32 to vector<24x3xf32>
    %38 = tpu.concatenate %36, %37 in 1 : vector<24x125xf32>, vector<24x3xf32> -> vector<24x128xf32>
    %39 = vector.extract_strided_slice %29 {offsets = [0, 4], sizes = [24, 124], strides = [1, 1]} : vector<24x128xf32> to vector<24x124xf32>
    %cst_12 = arith.constant 0.000000e+00 : f32
    %40 = vector.broadcast %cst_12 : f32 to vector<24x4xf32>
    %41 = tpu.concatenate %39, %40 in 1 : vector<24x124xf32>, vector<24x4xf32> -> vector<24x128xf32>
    %42 = vector.extract_strided_slice %29 {offsets = [0, 5], sizes = [24, 123], strides = [1, 1]} : vector<24x128xf32> to vector<24x123xf32>
    %cst_13 = arith.constant 0.000000e+00 : f32
    %43 = vector.broadcast %cst_13 : f32 to vector<24x5xf32>
    %44 = tpu.concatenate %42, %43 in 1 : vector<24x123xf32>, vector<24x5xf32> -> vector<24x128xf32>
    %45 = tpu.concatenate %29, %32, %35, %38, %41, %44 in 0 : vector<24x128xf32>, vector<24x128xf32>, vector<24x128xf32>, vector<24x128xf32>, vector<24x128xf32>, vector<24x128xf32> -> vector<144x128xf32>
    %cst_14 = arith.constant dense<0.000000e+00> : vector<16x128xf32>
    %46 = tpu.matmul %23, %45, %cst_14 {dimension_numbers = #tpu.dot_dimension_numbers<[1], [0], [0], [1], [0, 0, 1, 1], [], []>} : vector<16x144xf32>, vector<144x128xf32>, vector<16x128xf32> -> vector<16x128xf32>
    %cst_15 = arith.constant 0.000000e+00 : f32
    %47 = vector.shape_cast %11 : vector<1x128xi1> to vector<1x128xi1>
    %48 = vector.broadcast %47 : vector<1x128xi1> to vector<16x128xi1>
    %49 = vector.broadcast %cst_15 : f32 to vector<16x128xf32>
    %50 = arith.select %48, %46, %49 : vector<16x128xi1>, vector<16x128xf32>
    %cst_16 = arith.constant dense<0.000000e+00> : vector<16xf32>
    %51 = vector.multi_reduction <add>, %50, %cst_16 [1] : vector<16x128xf32> to vector<16xf32>
    %52 = vector.shape_cast %51 : vector<16xf32> to vector<16x1xf32>
    %53 = arith.mulf %50, %50 : vector<16x128xf32>
    %cst_17 = arith.constant dense<0.000000e+00> : vector<16xf32>
    %54 = vector.multi_reduction <add>, %53, %cst_17 [1] : vector<16x128xf32> to vector<16xf32>
    %55 = vector.shape_cast %54 : vector<16xf32> to vector<16x1xf32>
    %cst_18 = arith.constant 0.0161290318 : f32
    %56 = vector.broadcast %cst_18 : f32 to vector<16x1xf32>
    %57 = arith.mulf %52, %56 : vector<16x1xf32>
    %cst_19 = arith.constant 0.0161290318 : f32
    %58 = vector.broadcast %cst_19 : f32 to vector<16x1xf32>
    %59 = arith.mulf %55, %58 : vector<16x1xf32>
    %60 = arith.mulf %57, %57 : vector<16x1xf32>
    %61 = arith.subf %59, %60 : vector<16x1xf32>
    %cst_20 = arith.constant 9.99999974E-6 : f32
    %62 = vector.broadcast %cst_20 : f32 to vector<16x1xf32>
    %63 = arith.addf %61, %62 : vector<16x1xf32>
    %64 = math.rsqrt %63 : vector<16x1xf32>
    %65 = arith.mulf %25, %64 : vector<16x1xf32>
    %66 = arith.mulf %57, %65 : vector<16x1xf32>
    %67 = arith.subf %26, %66 : vector<16x1xf32>
    %68 = vector.broadcast %65 : vector<16x1xf32> to vector<16x128xf32>
    %69 = arith.mulf %46, %68 : vector<16x128xf32>
    %70 = vector.broadcast %67 : vector<16x1xf32> to vector<16x128xf32>
    %71 = arith.addf %69, %70 : vector<16x128xf32>
    %cst_21 = arith.constant 0.000000e+00 : f32
    %72 = vector.broadcast %cst_21 : f32 to vector<16x128xf32>
    %73 = arith.maximumf %71, %72 : vector<16x128xf32>
    %74 = vector.extract_strided_slice %73 {offsets = [0, 1], sizes = [16, 127], strides = [1, 1]} : vector<16x128xf32> to vector<16x127xf32>
    %cst_22 = arith.constant 0.000000e+00 : f32
    %75 = vector.broadcast %cst_22 : f32 to vector<16x1xf32>
    %76 = tpu.concatenate %74, %75 in 1 : vector<16x127xf32>, vector<16x1xf32> -> vector<16x128xf32>
    %77 = vector.extract_strided_slice %73 {offsets = [0, 2], sizes = [16, 126], strides = [1, 1]} : vector<16x128xf32> to vector<16x126xf32>
    %cst_23 = arith.constant 0.000000e+00 : f32
    %78 = vector.broadcast %cst_23 : f32 to vector<16x2xf32>
    %79 = tpu.concatenate %77, %78 in 1 : vector<16x126xf32>, vector<16x2xf32> -> vector<16x128xf32>
    %80 = vector.extract_strided_slice %73 {offsets = [0, 3], sizes = [16, 125], strides = [1, 1]} : vector<16x128xf32> to vector<16x125xf32>
    %cst_24 = arith.constant 0.000000e+00 : f32
    %81 = vector.broadcast %cst_24 : f32 to vector<16x3xf32>
    %82 = tpu.concatenate %80, %81 in 1 : vector<16x125xf32>, vector<16x3xf32> -> vector<16x128xf32>
    %83 = vector.extract_strided_slice %73 {offsets = [0, 4], sizes = [16, 124], strides = [1, 1]} : vector<16x128xf32> to vector<16x124xf32>
    %cst_25 = arith.constant 0.000000e+00 : f32
    %84 = vector.broadcast %cst_25 : f32 to vector<16x4xf32>
    %85 = tpu.concatenate %83, %84 in 1 : vector<16x124xf32>, vector<16x4xf32> -> vector<16x128xf32>
    %86 = vector.extract_strided_slice %73 {offsets = [0, 5], sizes = [16, 123], strides = [1, 1]} : vector<16x128xf32> to vector<16x123xf32>
    %cst_26 = arith.constant 0.000000e+00 : f32
    %87 = vector.broadcast %cst_26 : f32 to vector<16x5xf32>
    %88 = tpu.concatenate %86, %87 in 1 : vector<16x123xf32>, vector<16x5xf32> -> vector<16x128xf32>
    %89 = tpu.concatenate %73, %76, %79, %82, %85, %88 in 0 : vector<16x128xf32>, vector<16x128xf32>, vector<16x128xf32>, vector<16x128xf32>, vector<16x128xf32>, vector<16x128xf32> -> vector<96x128xf32>
    %cst_27 = arith.constant dense<0.000000e+00> : vector<8x128xf32>
    %90 = tpu.matmul %24, %89, %cst_27 {dimension_numbers = #tpu.dot_dimension_numbers<[1], [0], [0], [1], [0, 0, 1, 1], [], []>} : vector<8x96xf32>, vector<96x128xf32>, vector<8x128xf32> -> vector<8x128xf32>
    %cst_28 = arith.constant 0.000000e+00 : f32
    %91 = vector.shape_cast %22 : vector<1x128xi1> to vector<1x128xi1>
    %92 = vector.broadcast %91 : vector<1x128xi1> to vector<8x128xi1>
    %93 = vector.broadcast %cst_28 : f32 to vector<8x128xf32>
    %94 = arith.select %92, %90, %93 : vector<8x128xi1>, vector<8x128xf32>
    %cst_29 = arith.constant dense<0.000000e+00> : vector<8xf32>
    %95 = vector.multi_reduction <add>, %94, %cst_29 [1] : vector<8x128xf32> to vector<8xf32>
    %96 = vector.shape_cast %95 : vector<8xf32> to vector<8x1xf32>
    %97 = arith.mulf %94, %94 : vector<8x128xf32>
    %cst_30 = arith.constant dense<0.000000e+00> : vector<8xf32>
    %98 = vector.multi_reduction <add>, %97, %cst_30 [1] : vector<8x128xf32> to vector<8xf32>
    %99 = vector.shape_cast %98 : vector<8xf32> to vector<8x1xf32>
    %cst_31 = arith.constant 0.0192307699 : f32
    %100 = vector.broadcast %cst_31 : f32 to vector<8x1xf32>
    %101 = arith.mulf %96, %100 : vector<8x1xf32>
    %cst_32 = arith.constant 0.0192307699 : f32
    %102 = vector.broadcast %cst_32 : f32 to vector<8x1xf32>
    %103 = arith.mulf %99, %102 : vector<8x1xf32>
    %104 = arith.mulf %101, %101 : vector<8x1xf32>
    %105 = arith.subf %103, %104 : vector<8x1xf32>
    %cst_33 = arith.constant 9.99999974E-6 : f32
    %106 = vector.broadcast %cst_33 : f32 to vector<8x1xf32>
    %107 = arith.addf %105, %106 : vector<8x1xf32>
    %108 = math.rsqrt %107 : vector<8x1xf32>
    %109 = arith.mulf %27, %108 : vector<8x1xf32>
    %110 = arith.mulf %101, %109 : vector<8x1xf32>
    %111 = arith.subf %28, %110 : vector<8x1xf32>
    %112 = vector.broadcast %109 : vector<8x1xf32> to vector<8x128xf32>
    %113 = arith.mulf %90, %112 : vector<8x128xf32>
    %114 = vector.broadcast %111 : vector<8x1xf32> to vector<8x128xf32>
    %115 = arith.addf %113, %114 : vector<8x128xf32>
    %cst_34 = arith.constant 0.000000e+00 : f32
    %116 = vector.broadcast %cst_34 : f32 to vector<8x128xf32>
    %117 = arith.maximumf %115, %116 : vector<8x128xf32>
    %c0_35 = arith.constant 0 : index
    %c0_36 = arith.constant 0 : index
    %118 = vector.load %arg2[%c0_35, %c0_36] : memref<8x128xf32, #tpu.memory_space<vmem>>, vector<8x128xf32>
    tpu.vector_store %arg2[%c0_35, %c0_36], %117 {strides = array<i32>} : memref<8x128xf32, #tpu.memory_space<vmem>>, vector<8x128xf32>,
    return
  }
}

</mosaic_0001>

<bundles_post_ra>
// kernel: tpu_custom_call.1
= control target key start
LH: loop header
LB: loop body
LE: loop exit
PB: predicated region body
PF: predicated region fallthrough
CT: control target
= control target key end

     0   :  { %7 = vsyncpa [#allocation3], 0  ;;  %s679_s0 = inlined_call_operand.hbm [shape: f32[24,128], index: 0, kind: input, shape index: {}]   ;;  %s680_s1 = inlined_call_operand.hbm [shape: f32[72,144], index: 1, kind: input, shape index: {}]   ;;  %s681_s2 = inlined_call_operand.hbm [shape: f32[8,128], index: 2, kind: output, shape index: {}]  }
   0x1   :  { %8 = vsyncpa [#allocation6], 0 }
   0x2   :  { %9 = vsyncpa [#allocation4], 0  ;;  %s14_s11 = sshll.u32 %s679_s0, 4  ;;  %s537_s12 = smov [#allocation2]   ;;  %s15_s11 = int_to_ptr.hbm [resolvable:$true] %s14_s11 }
   0x3   :  { %s16_s13 = sshll.u32 %s537_s12, 4  ;;  %s27_s16 = sshll.u32 %s680_s1, 4  ;;  %s17_s13 = int_to_ptr.vmem [resolvable:$true] %s16_s13  ;;  %s28_s16 = int_to_ptr.hbm [resolvable:$true] %s27_s16 }
   0x4   :  { %s538_s17 = smov 128   ;;  %s539_s18 = smov 8  }
   0x5   :  { %22 = dma.hbm_to_vmem [thread:$0]  %s15_s11, 384, %s17_s13, [#allocation3], %s538_s17, %s538_s17, %s539_s18  }
   0x6   :  { %s540_s19 = smov [#allocation5]   ;;  %s541_s21 = smov 256  }
   0x7   :  { %s29_s20 = sshll.u32 %s540_s19, 4  ;;  %s542_s22 = smov 16   ;;  %s30_s20 = int_to_ptr.vmem [resolvable:$true] %s29_s20 }
   0x8   :  { %35 = dma.hbm_to_vmem [thread:$0]  %s28_s16, 2304, %s30_s20, [#allocation6], %s541_s21, %s541_s21, %s542_s22  }
   0x9   :  { %531 = dma.done.wait [#allocation3], 384  }
   0xa   :  { %532 = vsyncadd [#allocation3], 4294966912 }
   0xb   :  { %533 = dma.done.wait [#allocation6], 2304  }
   0xc   :  { %534 = vsyncadd [#allocation6], 4294964992  ;;  %v571_v0 = vld [vmem:[#allocation2] sm:$0xff]  ;;  %v573_v1 = vld [vmem:[#allocation2 + $0x8] sm:$0xff]  ;;  %s543_s0 = smov 123   ;;  %s544_s1 = smov 124   ;;  %v44_v22 = vlaneseq }
   0xd   :  { %127 = vrot.lane.b32.xlu0 %v571_v0, %s543_s0  ;;  %116 = vrot.lane.b32.xlu1 %v573_v1, %s544_s1  ;;  %v579_v2 = vld [vmem:[#allocation2 + $0x10] sm:$0xff]  ;;  %s545_s23 = smov 125   ;;  %s546_s24 = smov 126   ;;  %vm136_vm0 = vcmask 1006592   ;;  %vm123_vm1 = vcmask 1014784   ;;  %vm110_vm2 = vcmask 1022976  }
   0xe   :  { %105 = vrot.lane.b32.xlu2 %v579_v2, %s545_s23  ;;  %s547_s25 = smov 127   ;;  %vm97_vm3 = vcmask 1031168   ;;  %vm84_vm4 = vcmask 1039360   ;;  %v59_v18 = vld [vmem:[#allocation5 + $0x8] sm:$0xff]  ;;  %vm140_vm5 = vcmask 130048   ;;  %v58_v19 = vld [vmem:[#allocation5] sm:$0xff] }
   0xf   :  { %v60_v20 = vld [vmem:[#allocation5 + $0x10] sm:$0xff]  ;;  %v61_v21 = vld [vmem:[#allocation5 + $0x18] sm:$0xff]  ;;  %v641_v23 = vand.u32 127, %v44_v22  ;;  %v548_v34 = vmov 0   ;;  %v64_v56 = vld [vmem:[#allocation5 + $0x40] sm:$0xff]  ;;  %s549_s26 = smov [#allocation7]  }
  0x10   :  { %450 = vset.pattern.permute.xlu0 %v548_v34  ;;  %452 = vset.pattern.permute.xlu2 %v548_v34  ;;  %v66_v62 = vld [vmem:[#allocation5 + $0x60] sm:$0xff]  ;;  %s380_s27 = sshll.u32 %s549_s26, 4  ;;  %s382_s30 = sshll.u32 %s681_s2, 4  ;;  %s381_s27 = int_to_ptr.vmem [resolvable:$true] %s380_s27  ;;  %s383_s30 = int_to_ptr.hbm [resolvable:$true] %s382_s30 }
  0x11   :  { %vm49_vm6 = vcmp.ge.s32.totalorder %v641_v23, 36  ;;  %vm50_vm7 = vcmp.lt.s32.totalorder %v641_v23, 67  ;;  %vm47_vm8 = vcmp.lt.s32.totalorder %v641_v23, 31  ;;  %451 = vset.pattern.permute.xlu1 %v548_v34 }
  0x12   :  { %vm51_vm9 = vmand %vm49_vm6, %vm50_vm7 }
  0x13   :  { %vm52_vm10 = vmor %vm47_vm8, %vm51_vm9 }
  0x15   :  { %118 = vrot.lane.b32.xlu0 %v579_v2, %s544_s1  ;;  %114 = vrot.lane.b32.xlu1 %v571_v0, %s544_s1 }
  0x16   :  { %103 = vrot.lane.b32.xlu2 %v573_v1, %s545_s23 }
  0x1d   :  { %101 = vrot.lane.b32.xlu0 %v571_v0, %s545_s23  ;;  %92 = vrot.lane.b32.xlu1 %v579_v2, %s546_s24 }
  0x1e   :  { %90 = vrot.lane.b32.xlu2 %v573_v1, %s546_s24 }
  0x25   :  { %88 = vrot.lane.b32.xlu0 %v571_v0, %s546_s24  ;;  %79 = vrot.lane.b32.xlu1 %v579_v2, %s547_s25 }
  0x26   :  { %77 = vrot.lane.b32.xlu2 %v573_v1, %s547_s25 }
  0x2d   :  { %75 = vrot.lane.b32.xlu0 %v571_v0, %s547_s25  ;;  %131 = vrot.lane.b32.xlu1 %v579_v2, %s543_s0 }
  0x2e   :  { %129 = vrot.lane.b32.xlu2 %v573_v1, %s543_s0 }
  0x68   :  { %v106_v3 = vpop.permute.xlu2 %105 }
  0x70   :  { %v104_v6 = vpop.permute.xlu2 %103 }
  0x78   :  { %v91_v9 = vpop.permute.xlu2 %90 }
  0x7f   :  { %v128_v4 = vpop.permute.xlu0 %127  ;;  %v117_v5 = vpop.permute.xlu1 %116 }
  0x80   :  { %393 = vmatpush.msk.msra.mxu0 %vm136_vm0, %v128_v4  ;;  %421 = vmatpush.msk.msra.mxu3 %vm136_vm0, %v128_v4  ;;  %v78_v12 = vpop.permute.xlu2 %77 }
  0x87   :  { %v119_v7 = vpop.permute.xlu0 %118  ;;  %v115_v8 = vpop.permute.xlu1 %114 }
  0x88   :  { %394 = vmatpush.msk.msra.mxu0 %vm123_vm1, %v119_v7  ;;  %422 = vmatpush.msk.msra.mxu3 %vm123_vm1, %v119_v7  ;;  %v130_v17 = vpop.permute.xlu2 %129  ;;  %v65_v7 = vld [vmem:[#allocation5 + $0x50] sm:$0xff] }
  0x8a   :  { %395 = vmatpush.msk.msra.mxu0 %vm123_vm1, %v117_v5  ;;  %423 = vmatpush.msk.msra.mxu3 %vm123_vm1, %v117_v5 }
  0x8c   :  { %396 = vmatpush.msk.msra.mxu0 %vm123_vm1, %v115_v8  ;;  %424 = vmatpush.msk.msra.mxu3 %vm123_vm1, %v115_v8 }
  0x8e   :  { %397 = vmatpush.msk.msra.mxu0 %vm110_vm2, %v106_v3  ;;  %425 = vmatpush.msk.msra.mxu3 %vm110_vm2, %v106_v3 }
  0x8f   :  { %v102_v10 = vpop.permute.xlu0 %101  ;;  %v93_v11 = vpop.permute.xlu1 %92 }
  0x90   :  { %398 = vmatpush.msk.msra.mxu0 %vm110_vm2, %v104_v6  ;;  %426 = vmatpush.msk.msra.mxu3 %vm110_vm2, %v104_v6 }
  0x92   :  { %399 = vmatpush.msk.msra.mxu0 %vm110_vm2, %v102_v10  ;;  %427 = vmatpush.msk.msra.mxu3 %vm110_vm2, %v102_v10 }
  0x94   :  { %400 = vmatpush.msk.msra.mxu0 %vm97_vm3, %v93_v11  ;;  %428 = vmatpush.msk.msra.mxu3 %vm97_vm3, %v93_v11 }
  0x96   :  { %401 = vmatpush.msk.msra.mxu0 %vm97_vm3, %v91_v9  ;;  %429 = vmatpush.msk.msra.mxu3 %vm97_vm3, %v91_v9 }
  0x97   :  { %v89_v13 = vpop.permute.xlu0 %88  ;;  %v80_v14 = vpop.permute.xlu1 %79 }
  0x98   :  { %402 = vmatpush.msk.msra.mxu0 %vm97_vm3, %v89_v13  ;;  %430 = vmatpush.msk.msra.mxu3 %vm97_vm3, %v89_v13 }
  0x9a   :  { %403 = vmatpush.msk.msra.mxu0 %vm84_vm4, %v80_v14  ;;  %431 = vmatpush.msk.msra.mxu3 %vm84_vm4, %v80_v14 }
  0x9c   :  { %404 = vmatpush.msk.msra.mxu0 %vm84_vm4, %v78_v12  ;;  %432 = vmatpush.msk.msra.mxu3 %vm84_vm4, %v78_v12 }
  0x9f   :  { %v76_v15 = vpop.permute.xlu0 %75  ;;  %v132_v16 = vpop.permute.xlu1 %131 }
  0xa0   :  { %405 = vmatpush.msk.msra.mxu0 %vm84_vm4, %v76_v15  ;;  %433 = vmatpush.msk.msra.mxu3 %vm84_vm4, %v76_v15 }
  0xa1   :  { %406 = vmatpush.msk.msra.mxu1 %vm136_vm0, %v132_v16 }
  0xa2   :  { %160 = vmatpush.msra.mxu0 %v579_v2  ;;  %434 = vmatpush.msra.mxu3 %v579_v2  ;;  %v63_v2 = vld [vmem:[#allocation5 + $0x30] sm:$0xff] }
  0xa3   :  { %407 = vmatpush.msk.msra.mxu1 %vm136_vm0, %v130_v17 }
  0xa4   :  { %161 = vmatpush.msra.mxu0 %v573_v1  ;;  %435 = vmatpush.msra.mxu3 %v573_v1 }
  0xa5   :  { %408 = vmatmul.msk.f32.vlgmr.msra.gmra.mxu1 %vm140_vm5, %v59_v18 }
  0xa6   :  { %162 = vmatpush.msra.mxu0 %v571_v0  ;;  %436 = vmatpush.msra.mxu3 %v571_v0 }
  0xa7   :  { %163 = vmatmul.f32.vlgmr.msra.gmra.mxu0 %v58_v19  ;;  %166 = vmatmul.f32.vlgmr.msra.gmra.mxu3 %v60_v20 }
  0xad   :  { %409 = vmatmul.msk.f32.gmra.mxu1 %vm140_vm5, %v61_v21 }
 0x122   :  { %v187_v24 = vpop.f32.mrf.mxu1 }
 0x124   :  { %v164_v25 = vpop.f32.mrf.mxu0 }
 0x125   :  { %v648_v26 = vadd.f32 %v187_v24, %v164_v25 }
 0x127   :  { %v195_v27 = vsel %vm52_vm10, %v648_v26, 0.0 }
 0x128   :  { %197 = vadd.xlane.f32.xlu1 %v195_v27  ;;  %v201_v33 = vmul.f32 %v195_v27, %v195_v27 }
 0x12a   :  { %v167_v28 = vpop.f32.mrf.mxu3  ;;  %v190_v29 = vpop.f32.mrf.mxu1 }
 0x12b   :  { %v191_v30 = vadd.f32 %v190_v29, %v167_v28 }
 0x12d   :  { %v196_v31 = vsel %vm52_vm10, %v191_v30, 0.0 }
 0x12e   :  { %199 = vadd.xlane.f32.xlu0 %v196_v31  ;;  %v202_v32 = vmul.f32 %v196_v31, %v196_v31 }
 0x130   :  { %205 = vadd.xlane.f32.xlu2 %v202_v32 }
 0x138   :  { %203 = vadd.xlane.f32.xlu2 %v201_v33 }
 0x19b   :  { %v198_v40 = vpop.xlane.xlu1 %197 }
 0x19c   :  { %v207_v42 = vmul.f32 0.016129032, %v198_v40 }
 0x19e   :  { %v211_v45 = vmul.f32 %v207_v42, %v207_v42 }
 0x1a1   :  { %v200_v35 = vpop.xlane.xlu0 %199 }
 0x1a2   :  { %v208_v36 = vmul.f32 0.016129032, %v200_v35 }
 0x1a3   :  { %v206_v37 = vpop.xlane.xlu2 %205 }
 0x1a4   :  { %v212_v38 = vmul.f32 %v208_v36, %v208_v36  ;;  %v210_v39 = vmul.f32 0.016129032, %v206_v37 }
 0x1a6   :  { %v214_v41 = vsub.f32 %v210_v39, %v212_v38 }
 0x1a8   :  { %v216_v43 = vadd.f32 1e-05, %v214_v41 }
 0x1aa   :  { %453 = vrsqrt.f32 %v216_v43  ;;  %vm233_vm12 = vweird.f32 %v216_v43 }
 0x1ab   :  { %v204_v44 = vpop.xlane.xlu2 %203 }
 0x1ac   :  { %v209_v46 = vmul.f32 0.016129032, %v204_v44 }
 0x1ae   :  { %v213_v47 = vsub.f32 %v209_v46, %v211_v45  ;;  %v67_v45 = vld [vmem:[#allocation5 + $0x70] sm:$0xff] }
 0x1b0   :  { %v454_v48 = vpop.eup %453  ;;  %v215_v49 = vadd.f32 1e-05, %v213_v47 }
 0x1b1   :  { %v228_v50 = vmul.f32 %v454_v48, %v216_v43  ;;  %vm234_vm11 = vweird.f32 %v454_v48 }
 0x1b2   :  { %455 = vrsqrt.f32 %v215_v49  ;;  %vm235_vm13 = vmor %vm233_vm12, %vm234_vm11  ;;  %vm223_vm15 = vweird.f32 %v215_v49 }
 0x1b3   :  { %v229_v51 = vmul.f32 %v454_v48, %v228_v50  ;;  %v68_v50 = vld [vmem:[#allocation5 + $0x80] sm:$0xff] }
 0x1b5   :  { %v230_v52 = vmul.f32 0.5, %v229_v51 }
 0x1b7   :  { %v231_v53 = vsub.f32 1.5, %v230_v52 }
 0x1b8   :  { %v456_v54 = vpop.eup %455 }
 0x1b9   :  { %v218_v55 = vmul.f32 %v456_v54, %v215_v49  ;;  %v232_v57 = vmul.f32 %v454_v48, %v231_v53  ;;  %vm224_vm14 = vweird.f32 %v456_v54 }
 0x1ba   :  { %vm225_vm5 = vmor %vm223_vm15, %vm224_vm14 }
 0x1bb   :  { %v219_v58 = vmul.f32 %v456_v54, %v218_v55  ;;  %v236_v59 = vsel %vm235_vm13, %v454_v48, %v232_v57 }
 0x1bc   :  { %v238_v60 = vmul.f32 %v236_v59, %v64_v56 }
 0x1bd   :  { %v220_v61 = vmul.f32 0.5, %v219_v58 }
 0x1be   :  { %250 = vperm.xlu0 %450, %v238_v60   ;;  %v240_v63 = vmul.f32 %v238_v60, %v208_v36 }
 0x1bf   :  { %v221_v0 = vsub.f32 1.5, %v220_v61 }
 0x1c0   :  { %v242_v1 = vsub.f32 %v66_v62, %v240_v63 }
 0x1c1   :  { %v222_v3 = vmul.f32 %v456_v54, %v221_v0 }
 0x1c2   :  { %262 = vperm.xlu2 %452, %v242_v1  }
 0x1c3   :  { %v226_v4 = vsel %vm225_vm5, %v456_v54, %v222_v3 }
 0x1c4   :  { %v237_v5 = vmul.f32 %v226_v4, %v63_v2 }
 0x1c6   :  { %245 = vperm.xlu1 %451, %v237_v5   ;;  %v239_v6 = vmul.f32 %v237_v5, %v207_v42 }
 0x1c8   :  { %v241_v8 = vsub.f32 %v65_v7, %v239_v6 }
 0x1ce   :  { %257 = vperm.xlu1 %451, %v241_v8  }
 0x21c   :  { %v263_v11 = vpop.permute.xlu2 %262 }
 0x230   :  { %v251_v9 = vpop.permute.xlu0 %250 }
 0x231   :  { %v254_v10 = vmul.f32 %v251_v9, %v191_v30  ;;  %v62_v30 = vld [vmem:[#allocation5 + $0x20] sm:$0xff] }
 0x233   :  { %v266_v12 = vadd.f32 %v263_v11, %v254_v10 }
 0x235   :  { %v268_v13 = vmax.f32 %v266_v12, 0.0 }
 0x237   :  { %305 = vrot.lane.b32.xlu2 %v268_v13, %s543_s0 }
 0x238   :  { %v246_v14 = vpop.permute.xlu1 %245 }
 0x239   :  { %v253_v15 = vmul.f32 %v246_v14, %v648_v26 }
 0x23f   :  { %297 = vrot.lane.b32.xlu2 %v268_v13, %s544_s1 }
 0x240   :  { %v258_v16 = vpop.permute.xlu1 %257 }
 0x241   :  { %v265_v17 = vadd.f32 %v258_v16, %v253_v15 }
 0x243   :  { %v267_v18 = vmax.f32 %v265_v17, 0.0 }
 0x245   :  { %295 = vrot.lane.b32.xlu0 %v267_v18, %s544_s1  ;;  %303 = vrot.lane.b32.xlu1 %v267_v18, %s543_s0 }
 0x247   :  { %287 = vrot.lane.b32.xlu2 %v267_v18, %s545_s23 }
 0x24d   :  { %281 = vrot.lane.b32.xlu0 %v268_v13, %s546_s24  ;;  %289 = vrot.lane.b32.xlu1 %v268_v13, %s545_s23 }
 0x24f   :  { %273 = vrot.lane.b32.xlu2 %v268_v13, %s547_s25 }
 0x255   :  { %271 = vrot.lane.b32.xlu0 %v267_v18, %s547_s25  ;;  %279 = vrot.lane.b32.xlu1 %v267_v18, %s546_s24 }
 0x291   :  { %v306_v19 = vpop.permute.xlu2 %305 }
 0x292   :  { %410 = vmatpush.msk.msra.mxu2 %vm136_vm0, %v306_v19 }
 0x299   :  { %v298_v20 = vpop.permute.xlu2 %297 }
 0x2a1   :  { %v288_v24 = vpop.permute.xlu2 %287 }
 0x2a9   :  { %v274_v28 = vpop.permute.xlu2 %273 }
 0x2b7   :  { %v296_v21 = vpop.permute.xlu0 %295  ;;  %v304_v22 = vpop.permute.xlu1 %303 }
 0x2b8   :  { %411 = vmatpush.msk.msra.mxu2 %vm136_vm0, %v304_v22  ;;  %vm311_vm0 = vcmask 785408  }
 0x2ba   :  { %412 = vmatpush.msk.msra.mxu2 %vm123_vm1, %v298_v20 }
 0x2bc   :  { %413 = vmatpush.msk.msra.mxu2 %vm123_vm1, %v296_v21  ;;  %vm55_vm1 = vcmp.lt.s32.totalorder %v641_v23, 62 }
 0x2bd   :  { %vm56_vm7 = vmand %vm49_vm6, %vm55_vm1 }
 0x2bf   :  { %v290_v25 = vpop.permute.xlu1 %289  ;;  %v282_v26 = vpop.permute.xlu0 %281 }
 0x2c0   :  { %414 = vmatpush.msk.msra.mxu2 %vm110_vm2, %v290_v25 }
 0x2c2   :  { %415 = vmatpush.msk.msra.mxu2 %vm110_vm2, %v288_v24  ;;  %vm53_vm2 = vcmp.lt.s32.totalorder %v641_v23, 26 }
 0x2c3   :  { %vm57_vm8 = vmor %vm53_vm2, %vm56_vm7 }
 0x2c4   :  { %416 = vmatpush.msk.msra.mxu2 %vm97_vm3, %v282_v26 }
 0x2c7   :  { %v280_v27 = vpop.permute.xlu1 %279  ;;  %v272_v29 = vpop.permute.xlu0 %271 }
 0x2c8   :  { %417 = vmatpush.msk.msra.mxu2 %vm97_vm3, %v280_v27 }
 0x2ca   :  { %418 = vmatpush.msk.msra.mxu2 %vm84_vm4, %v274_v28 }
 0x2cc   :  { %419 = vmatpush.msk.msra.mxu2 %vm84_vm4, %v272_v29 }
 0x2ce   :  { %329 = vmatpush.msra.mxu2 %v268_v13 }
 0x2d0   :  { %330 = vmatpush.msra.mxu2 %v267_v18 }
 0x2d1   :  { %420 = vmatmul.msk.f32.vlgmr.msra.gmra.mxu2 %vm311_vm0, %v62_v30 }
 0x354   :  { %v332_v31 = vpop.f32.mrf.mxu2 }
 0x355   :  { %v337_v32 = vsel %vm57_vm8, %v332_v31, 0.0 }
 0x356   :  { %338 = vadd.xlane.f32.xlu1 %v337_v32  ;;  %v340_v33 = vmul.f32 %v337_v32, %v337_v32 }
 0x358   :  { %341 = vadd.xlane.f32.xlu2 %v340_v33 }
 0x3c9   :  { %v339_v34 = vpop.xlane.xlu1 %338 }
 0x3ca   :  { %v343_v35 = vmul.f32 0.01923077, %v339_v34 }
 0x3cb   :  { %v342_v36 = vpop.xlane.xlu2 %341 }
 0x3cc   :  { %v345_v37 = vmul.f32 %v343_v35, %v343_v35  ;;  %v344_v38 = vmul.f32 0.01923077, %v342_v36 }
 0x3ce   :  { %v346_v39 = vsub.f32 %v344_v38, %v345_v37 }
 0x3d0   :  { %v347_v40 = vadd.f32 1e-05, %v346_v39 }
 0x3d2   :  { %457 = vrsqrt.f32 %v347_v40  ;;  %vm354_vm4 = vweird.f32 %v347_v40 }
 0x3d8   :  { %v458_v41 = vpop.eup %457 }
 0x3d9   :  { %v349_v42 = vmul.f32 %v458_v41, %v347_v40  ;;  %vm355_vm3 = vweird.f32 %v458_v41 }
 0x3da   :  { %vm356_vm6 = vmor %vm354_vm4, %vm355_vm3 }
 0x3db   :  { %v350_v43 = vmul.f32 %v458_v41, %v349_v42 }
 0x3dd   :  { %v351_v44 = vmul.f32 0.5, %v350_v43 }
 0x3df   :  { %v352_v23 = vsub.f32 1.5, %v351_v44 }
 0x3e1   :  { %v353_v46 = vmul.f32 %v458_v41, %v352_v23 }
 0x3e3   :  { %v357_v47 = vsel %vm356_vm6, %v458_v41, %v353_v46 }
 0x3e4   :  { %v358_v48 = vmul.f32 %v357_v47, %v67_v45 }
 0x3e6   :  { %363 = vperm.xlu0 %450, %v358_v48   ;;  %v359_v49 = vmul.f32 %v358_v48, %v343_v35 }
 0x3e8   :  { %v360_v51 = vsub.f32 %v68_v50, %v359_v49 }
 0x3ee   :  { %369 = vperm.xlu0 %450, %v360_v51  }
 0x458   :  { %v364_v52 = vpop.permute.xlu0 %363 }
 0x459   :  { %v366_v53 = vmul.f32 %v364_v52, %v332_v31 }
 0x460   :  { %v370_v54 = vpop.permute.xlu0 %369 }
 0x461   :  { %v372_v55 = vadd.f32 %v370_v54, %v366_v53 }
 0x463   :  { %v373_v56 = vmax.f32 %v372_v55, 0.0 }
 0x465   :  { %374 = vst [vmem:[#allocation7] sm:$0xff] %v373_v56 }
 0x466   :  { %385 = dma.vmem_to_hbm [thread:$0]  %s381_s27, 128, %s383_s30, [#allocation4]  }
 0x467   :  { %535 = dma.done.wait [#allocation4], 128  }
 0x468   :  { %536 = vsyncadd [#allocation4], 4294967168 }
 0x469   :  { %390 = vsyncpa [#allocation3], 1 }
 0x46a   :  { %391 = vsyncpa [#allocation6], 1 }
 0x46b   :  { %392 = vsyncpa [#allocation4], 1 }

</bundles_post_ra>
